<compile_context>
chip_gen: v5e
topology: v5e:2x2
jax: 0.10.0
libtpu: 0.0.40
codegen_flags: <defaults>
</compile_context>

<pallas_src>
import jax
import jax.numpy as jnp
from jax import lax
from jax.experimental import pallas as pl
from jax.experimental.pallas import tpu as pltpu

_LN2 = 0.6931471805599453


def _round_up(x, m):
    return (x + m - 1) // m * m


def _vmem_plan():
    """Chip-aware (vmem_limit_bytes, input_budget_bytes)."""
    cap = 0
    try:
        cap = int(pltpu.get_tpu_info().vmem_capacity_bytes)
    except Exception:
        cap = 0
    if cap <= 0:
        cap = 64 * 1024 * 1024           # conservative fallback: v7x per-TC VMEM
    # Scoped limit <= ~62% of physical, capped at 80 MiB:
    #   v7x (64 MiB/TC)  -> limit 40 MiB, input budget 30 MiB
    #   v5e/v6e (128 MiB) -> limit 80 MiB, input budget 60 MiB
    limit = min((cap * 5) // 8, 80 * 1024 * 1024)
    budget = (limit * 3) // 4            # ~25% headroom for outputs / internal scratch
    return limit, budget


def _log_sigmoid(x):
    # Numerically stable logsigmoid(x) = min(x, 0) - log(1 + exp(-|x|)).
    # (log/exp instead of log1p keeps the Mosaic lowering trivial; difference < 1e-7.)
    return jnp.minimum(x, 0.0) - jnp.log(1.0 + jnp.exp(-jnp.abs(x)))


# ---------------------------------------------------------------------------
# Path (a): embedding tables resident in VMEM, in-kernel gather via one-hot matmul.
# ---------------------------------------------------------------------------
def _w2v_resident_kernel(idx_t_ref, idx_c_ref, t_tab_ref, c_tab_ref, out_ref):
    tb = idx_t_ref.shape[0]
    v_pad = t_tab_ref.shape[0]

    idx_t = idx_t_ref[...]                                       # (tb, 1) int32
    idx_c = idx_c_ref[...]                                       # (tb, 1) int32
    col = lax.broadcasted_iota(jnp.int32, (tb, v_pad), 1)

    tab_t = t_tab_ref[...]                                       # (V_pad, E_pad)
    tab_c = c_tab_ref[...]

    # One-hot rows; padding rows use sentinel index -1 which matches no column
    # -> all-zero row -> zero embedding -> dot 0 -> logsigmoid(0) = -ln2 (fixed
    # up in the wrapper).  NOTE: depending on the compiler's default matmul
    # precision, f32 tables may be rounded through bf16 MXU passes here; the
    # one-hot operand itself is exact.
    oh_t = (col == idx_t).astype(tab_t.dtype)                    # (tb, V_pad)
    oh_c = (col == idx_c).astype(tab_c.dtype)

    emb_t = jnp.dot(oh_t, tab_t, preferred_element_type=jnp.float32)   # (tb, E_pad)
    emb_c = jnp.dot(oh_c, tab_c, preferred_element_type=jnp.float32)

    dot = jnp.sum(emb_t * emb_c, axis=1, keepdims=True)          # (tb, 1)
    partial = jnp.sum(_log_sigmoid(dot))
    # Lane-dense (1, 1, 128) store -> unmasked vst.
    out_ref[...] = jnp.full(out_ref.shape, partial, dtype=out_ref.dtype)


# ---------------------------------------------------------------------------
# Path (b): wrapper-side gather, kernel streams dense (tb, E) tiles.
# ---------------------------------------------------------------------------
def _w2v_stream_kernel(t_ref, c_ref, out_ref):
    t = t_ref[...].astype(jnp.float32)                           # (tb, E_pad)
    c = c_ref[...].astype(jnp.float32)
    dot = jnp.sum(t * c, axis=1, keepdims=True)                  # (tb, 1)
    partial = jnp.sum(_log_sigmoid(dot))
    out_ref[...] = jnp.full(out_ref.shape, partial, dtype=out_ref.dtype)


def word2vec_forward(target_word, context_word, target_embeddings, context_embeddings,
                     *, block_rows=None, use_table_resident_gather=None,
                     stream_dtype=None):
    """Scalar -sum(logsigmoid(<emb_t, emb_c>)) loss, matching the PyTorch module.

    block_rows=None lets the VMEM budget (not an arbitrary cap) bind the tile size.
    stream_dtype (e.g. jnp.bfloat16) is an opt-in bandwidth saver; default keeps f32.
    """
    B = int(target_word.shape[0])
    V, E = target_embeddings.shape
    E_pad = _round_up(E, 128)
    V_pad = _round_up(V, 128)

    vmem_limit, budget = _vmem_plan()
    compiler_params = pltpu.CompilerParams(
        dimension_semantics=("parallel",),   # each grid step owns its own output block
        vmem_limit_bytes=vmem_limit,
    )

    tab_itemsize = jnp.dtype(target_embeddings.dtype).itemsize
    resident_table_bytes = 2 * 2 * V_pad * E_pad * max(tab_itemsize, 4)
    if use_table_resident_gather is None:
        # In-kernel gather only when both tables comfortably fit VMEM and the
        # per-row one-hot matmul stays cheap relative to HBM streaming.
        use_table_resident_gather = (V <= 2048) and (resident_table_bytes <= budget // 2)

    def _pick_tb(bytes_per_row, budget_bytes):
        max_rows = max(8, (budget_bytes // max(bytes_per_row, 1)) // 8 * 8)
        tb = min(_round_up(B, 8), max_rows)
        if block_rows is not None:
            tb = min(tb, max(8, _round_up(int(block_rows), 8)))
        # Keep >= 2 grid blocks when the batch allows it so the parallel axis can
        # shard across both TensorCores on v7x.
        tb = max(8, min(tb, _round_up(-(-B // 2), 8)))
        return tb

    if use_table_resident_gather:
        # ---------------- path (a): indices streamed, tables VMEM-resident
        tab_t = target_embeddings
        tab_c = context_embeddings
        if stream_dtype is not None:
            tab_t = tab_t.astype(stream_dtype)
            tab_c = tab_c.astype(stream_dtype)
        pad_tab = ((0, V_pad - V), (0, E_pad - E))
        if pad_tab != ((0, 0), (0, 0)):
            tab_t = jnp.pad(tab_t, pad_tab)
            tab_c = jnp.pad(tab_c, pad_tab)

        # Per-row VMEM cost: 2 idx inputs x 2 pipeline buffers (lane-padded int32)
        # + f32 one-hot / gathered-embedding temporaries.
        per_row = 2 * 2 * 128 * 4 + 8 * (V_pad + E_pad)
        tb = _pick_tb(per_row, budget - resident_table_bytes)

        b_pad = _round_up(B, tb)
        idx_t = jnp.pad(target_word.astype(jnp.int32).reshape(B, 1),
                        ((0, b_pad - B), (0, 0)), constant_values=-1)
        idx_c = jnp.pad(context_word.astype(jnp.int32).reshape(B, 1),
                        ((0, b_pad - B), (0, 0)), constant_values=-1)
        g = b_pad // tb

        partials = pl.pallas_call(
            _w2v_resident_kernel,
            out_shape=jax.ShapeDtypeStruct((g, 1, 128), jnp.float32),
            grid_spec=pltpu.PrefetchScalarGridSpec(
                num_scalar_prefetch=0,
                grid=(g,),
                in_specs=[
                    pl.BlockSpec((tb, 1), lambda i: (i, 0)),
                    pl.BlockSpec((tb, 1), lambda i: (i, 0)),
                    # Constant index maps -> tables stay resident across the grid.
                    pl.BlockSpec((V_pad, E_pad), lambda i: (0, 0)),
                    pl.BlockSpec((V_pad, E_pad), lambda i: (0, 0)),
                ],
                out_specs=pl.BlockSpec((1, 1, 128), lambda i: (i, 0, 0)),
            ),
            compiler_params=compiler_params,
        )(idx_t, idx_c, tab_t, tab_c)
    else:
        # ---------------- path (b): wrapper-side gather, dense streaming kernel
        # TODO(synk): for very large B this still materializes 2*B*E in HBM; XLA's
        # allow_input_fusion could fuse the gathers into the pallas_call when the
        # toolchain supports fusing gather producers.
        emb_t = jnp.take(target_embeddings, target_word, axis=0)
        emb_c = jnp.take(context_embeddings, context_word, axis=0)
        if stream_dtype is not None:
            emb_t = emb_t.astype(stream_dtype)   # opt-in: halves HBM bytes
            emb_c = emb_c.astype(stream_dtype)
        if E_pad != E:
            emb_t = jnp.pad(emb_t, ((0, 0), (0, E_pad - E)))
            emb_c = jnp.pad(emb_c, ((0, 0), (0, E_pad - E)))

        itemsize = jnp.dtype(emb_t.dtype).itemsize
        per_row = 2 * 2 * E_pad * itemsize       # 2 inputs x 2 pipeline buffers
        tb = _pick_tb(per_row, budget)

        b_pad = _round_up(B, tb)
        if b_pad != B:
            pad = ((0, b_pad - B), (0, 0))
            emb_t = jnp.pad(emb_t, pad)
            emb_c = jnp.pad(emb_c, pad)
        g = b_pad // tb

        partials = pl.pallas_call(
            _w2v_stream_kernel,
            out_shape=jax.ShapeDtypeStruct((g, 1, 128), jnp.float32),
            grid_spec=pltpu.PrefetchScalarGridSpec(
                num_scalar_prefetch=0,
                grid=(g,),
                in_specs=[
                    pl.BlockSpec((tb, E_pad), lambda i: (i, 0)),
                    pl.BlockSpec((tb, E_pad), lambda i: (i, 0)),
                ],
                out_specs=pl.BlockSpec((1, 1, 128), lambda i: (i, 0, 0)),
            ),
            compiler_params=compiler_params,
        )(emb_t, emb_c)

    # Every padded row (zero embedding / sentinel index -1) contributes exactly
    # logsigmoid(0) = -ln2 to the summed partials; undo that here.
    n_pad = b_pad - B
    total = jnp.sum(partials[:, 0, 0])
    return -(total + n_pad * _LN2)


def _reference(target_word, context_word, target_embeddings, context_embeddings):
    emb_t = target_embeddings[target_word]
    emb_c = context_embeddings[context_word]
    dot = jnp.sum(emb_t * emb_c, axis=1)
    return -jnp.sum(jax.nn.log_sigmoid(dot))


if __name__ == "__main__":
    base_key = jax.random.PRNGKey(0)

    def check(vocab, emb, batch, salt, rtol, atol, **kwargs):
        kt, kc, ktw, kcw = jax.random.split(jax.random.fold_in(base_key, salt), 4)
        t_tab = jax.random.normal(kt, (vocab, emb), jnp.float32)
        c_tab = jax.random.normal(kc, (vocab, emb), jnp.float32)
        tw = jax.random.randint(ktw, (batch,), 0, vocab, jnp.int32)
        cw = jax.random.randint(kcw, (batch,), 0, vocab, jnp.int32)
        out = jax.block_until_ready(word2vec_forward(tw, cw, t_tab, c_tab, **kwargs))
        ref = _reference(tw, cw, t_tab, c_tab)
        assert jnp.allclose(out, ref, rtol=rtol, atol=atol), (kwargs, out, ref)

    # Path (a) in-kernel gather: looser tolerance covers possible bf16 rounding of
    # the f32 tables inside the one-hot MXU matmul (default matmul precision);
    # any gather/reduction bug would miss by orders of magnitude more.
    check(vocab=64, emb=128, batch=8, salt=0, rtol=2e-2, atol=1e-2)
    # Path (a), batch not a multiple of 8 (exercises the -ln2 padding fix-up).
    check(vocab=64, emb=128, batch=50, salt=1, rtol=2e-2, atol=1e-2)
    # Path (b) streaming kernel (forced): exact f32 math, tight tolerance.
    check(vocab=64, emb=128, batch=50, salt=2, rtol=1e-5, atol=1e-4,
          use_table_resident_gather=False)
    # Ragged vocab / embedding sizes (exercise V- and E-padding) on both paths.
    check(vocab=40, emb=72, batch=13, salt=3, rtol=2e-2, atol=1e-2)
    check(vocab=40, emb=72, batch=13, salt=4, rtol=1e-5, atol=1e-4,
          use_table_resident_gather=False)

    print("KERNEL_OK")
</pallas_src>

<mosaic_0001>
module attributes {stable_mosaic.version = 11 : i64} {
  func.func @_w2v_resident_kernel(%arg0: i32, %arg1: memref<8x1xi32, #tpu.memory_space<vmem>>, %arg2: memref<8x1xi32, #tpu.memory_space<vmem>>, %arg3: memref<128x128xf32, #tpu.memory_space<vmem>>, %arg4: memref<128x128xf32, #tpu.memory_space<vmem>>, %arg5: memref<1x1x128xf32, #tpu.memory_space<vmem>>) attributes {dimension_semantics = [#tpu.dimension_semantics<parallel>], iteration_bounds = array<i64: 1>, scalar_prefetch = 0 : i64, scratch_operands = 0 : i64, tpu.core_type = #tpu.core_type<tc>, window_params = [{transform_indices = @transform_0, window_bounds = array<i64: 8, 1>}, {transform_indices = @transform_1, window_bounds = array<i64: 8, 1>}, {pipeline_mode = #tpu.pipeline_mode<synchronous>, transform_indices = @transform_2, window_bounds = array<i64: 128, 128>}, {pipeline_mode = #tpu.pipeline_mode<synchronous>, transform_indices = @transform_3, window_bounds = array<i64: 128, 128>}, {transform_indices = @transform_4, window_bounds = array<i64: 1, 1, 128>}]} {
    %c0 = arith.constant 0 : index
    %c0_0 = arith.constant 0 : index
    %0 = vector.load %arg1[%c0, %c0_0] : memref<8x1xi32, #tpu.memory_space<vmem>>, vector<8x1xi32>
    %c0_1 = arith.constant 0 : index
    %c0_2 = arith.constant 0 : index
    %1 = vector.load %arg2[%c0_1, %c0_2] : memref<8x1xi32, #tpu.memory_space<vmem>>, vector<8x1xi32>
    %2 = tpu.iota {dimensions = array<i32: 1>} : vector<8x128xi32>
    %c0_3 = arith.constant 0 : index
    %c0_4 = arith.constant 0 : index
    %3 = vector.load %arg3[%c0_3, %c0_4] : memref<128x128xf32, #tpu.memory_space<vmem>>, vector<128x128xf32>
    %c0_5 = arith.constant 0 : index
    %c0_6 = arith.constant 0 : index
    %4 = vector.load %arg4[%c0_5, %c0_6] : memref<128x128xf32, #tpu.memory_space<vmem>>, vector<128x128xf32>
    %5 = vector.broadcast %0 : vector<8x1xi32> to vector<8x128xi32>
    %6 = arith.cmpi eq, %2, %5 : vector<8x128xi32>
    %7 = arith.extui %6 : vector<8x128xi1> to vector<8x128xi32>
    %8 = arith.sitofp %7 : vector<8x128xi32> to vector<8x128xf32>
    %9 = vector.broadcast %1 : vector<8x1xi32> to vector<8x128xi32>
    %10 = arith.cmpi eq, %2, %9 : vector<8x128xi32>
    %11 = arith.extui %10 : vector<8x128xi1> to vector<8x128xi32>
    %12 = arith.sitofp %11 : vector<8x128xi32> to vector<8x128xf32>
    %cst = arith.constant dense<0.000000e+00> : vector<8x128xf32>
    %13 = tpu.matmul %8, %3, %cst {dimension_numbers = #tpu.dot_dimension_numbers<[1], [0], [0], [1], [0, 0, 1, 1], [], []>} : vector<8x128xf32>, vector<128x128xf32>, vector<8x128xf32> -> vector<8x128xf32>
    %cst_7 = arith.constant dense<0.000000e+00> : vector<8x128xf32>
    %14 = tpu.matmul %12, %4, %cst_7 {dimension_numbers = #tpu.dot_dimension_numbers<[1], [0], [0], [1], [0, 0, 1, 1], [], []>} : vector<8x128xf32>, vector<128x128xf32>, vector<8x128xf32> -> vector<8x128xf32>
    %15 = arith.mulf %13, %14 : vector<8x128xf32>
    %cst_8 = arith.constant dense<0.000000e+00> : vector<8xf32>
    %16 = vector.multi_reduction <add>, %15, %cst_8 [1] : vector<8x128xf32> to vector<8xf32>
    %17 = vector.shape_cast %16 : vector<8xf32> to vector<8x1xf32>
    %cst_9 = arith.constant 0.000000e+00 : f32
    %18 = vector.broadcast %cst_9 : f32 to vector<8x1xf32>
    %19 = arith.minimumf %17, %18 : vector<8x1xf32>
    %20 = math.absf %17 : vector<8x1xf32>
    %cst_10 = arith.constant 0.000000e+00 : f32
    %21 = vector.broadcast %cst_10 : f32 to vector<8x1xf32>
    %22 = arith.subf %21, %20 : vector<8x1xf32>
    %23 = math.exp %22 : vector<8x1xf32>
    %cst_11 = arith.constant 1.000000e+00 : f32
    %24 = vector.broadcast %cst_11 : f32 to vector<8x1xf32>
    %25 = arith.addf %24, %23 : vector<8x1xf32>
    %26 = math.log %25 : vector<8x1xf32>
    %27 = arith.subf %19, %26 : vector<8x1xf32>
    %28 = vector.shape_cast %27 : vector<8x1xf32> to vector<1x8x1xf32>
    %cst_12 = arith.constant dense<0.000000e+00> : vector<1xf32>
    %29 = vector.multi_reduction <add>, %28, %cst_12 [1, 2] : vector<1x8x1xf32> to vector<1xf32>
    %30 = vector.shape_cast %29 : vector<1xf32> to vector<1x1x1xf32>
    %31 = vector.extract %30[0, 0, 0] : f32 from vector<1x1x1xf32>
    %32 = vector.broadcast %31 : f32 to vector<1x1x128xf32>
    %c0_13 = arith.constant 0 : index
    %c0_14 = arith.constant 0 : index
    %c0_15 = arith.constant 0 : index
    %33 = vector.load %arg5[%c0_13, %c0_14, %c0_15] : memref<1x1x128xf32, #tpu.memory_space<vmem>>, vector<1x1x128xf32>
    tpu.vector_store %arg5[%c0_13, %c0_14, %c0_15], %32 {strides = array<i32>} : memref<1x1x128xf32, #tpu.memory_space<vmem>>, vector<1x1x128xf32>,
    return
  }
  func.func @transform_0(%arg0: i32) -> (i32, i32) {
    %c0_i32 = arith.constant 0 : i32
    %c0_i32_0 = arith.constant 0 : i32
    return %arg0, %c0_i32 : i32, i32
  }
  func.func @transform_1(%arg0: i32) -> (i32, i32) {
    %c0_i32 = arith.constant 0 : i32
    %c0_i32_0 = arith.constant 0 : i32
    return %arg0, %c0_i32 : i32, i32
  }
  func.func @transform_2(%arg0: i32) -> (i32, i32) {
    %c0_i32 = arith.constant 0 : i32
    %c0_i32_0 = arith.constant 0 : i32
    %c0_i32_1 = arith.constant 0 : i32
    return %c0_i32, %c0_i32_0 : i32, i32
  }
  func.func @transform_3(%arg0: i32) -> (i32, i32) {
    %c0_i32 = arith.constant 0 : i32
    %c0_i32_0 = arith.constant 0 : i32
    %c0_i32_1 = arith.constant 0 : i32
    return %c0_i32, %c0_i32_0 : i32, i32
  }
  func.func @transform_4(%arg0: i32) -> (i32, i32, i32) {
    %c0_i32 = arith.constant 0 : i32
    %c0_i32_0 = arith.constant 0 : i32
    %c0_i32_1 = arith.constant 0 : i32
    return %arg0, %c0_i32, %c0_i32_0 : i32, i32, i32
  }
}

</mosaic_0001>

<bundles_post_ra>
// kernel: tpu_custom_call.1
= control target key start
LH: loop header
LB: loop body
LE: loop exit
PB: predicated region body
PF: predicated region fallthrough
CT: control target
= control target key end

     0   :  { %9 = vsyncpa [#allocation3], 0  ;;  %s324_s0 = inlined_call_operand.vmem [shape: s32[8,1], index: 0, kind: input, shape index: {}]   ;;  %s325_s1 = inlined_call_operand.vmem [shape: s32[8,1], index: 1, kind: input, shape index: {}]   ;;  %s326_s2 = inlined_call_operand.hbm [shape: f32[128,128], index: 2, kind: input, shape index: {}]   ;;  %s327_s3 = inlined_call_operand.hbm [shape: f32[128,128], index: 3, kind: input, shape index: {}]   ;;  %s328_s4 = inlined_call_operand.hbm [shape: f32[1,1,128], index: 4, kind: output, shape index: {}]  }
   0x1   :  { %10 = vsyncpa [#allocation6], 0 }
   0x2   :  { %11 = vsyncpa [#allocation4], 0  ;;  %s20_s17 = sshll.u32 %s326_s2, 4  ;;  %s277_s18 = smov [#allocation2]   ;;  %s21_s17 = int_to_ptr.hbm [resolvable:$true] %s20_s17 }
   0x3   :  { %s22_s19 = sshll.u32 %s277_s18, 4  ;;  %s33_s22 = sshll.u32 %s327_s3, 4  ;;  %s23_s19 = int_to_ptr.vmem [resolvable:$true] %s22_s19  ;;  %s34_s22 = int_to_ptr.hbm [resolvable:$true] %s33_s22 }
   0x4   :  { %s278_s23 = smov 128   ;;  %s279_s24 = smov 8  }
   0x5   :  { %28 = dma.hbm_to_vmem [thread:$0]  %s21_s17, 2048, %s23_s19, [#allocation3], %s278_s23, %s278_s23, %s279_s24  }
   0x6   :  { %s280_s25 = smov [#allocation5]  }
   0x7   :  { %s35_s26 = sshll.u32 %s280_s25, 4  ;;  %s36_s26 = int_to_ptr.vmem [resolvable:$true] %s35_s26 }
   0x8   :  { %41 = dma.hbm_to_vmem [thread:$0]  %s34_s22, 2048, %s36_s26, [#allocation6], %s278_s23, %s278_s23, %s279_s24  }
   0x9   :  { %271 = dma.done.wait [#allocation3], 2048  }
   0xa   :  { %272 = vsyncadd [#allocation3], 4294965248 }
   0xb   :  { %273 = dma.done.wait [#allocation6], 2048  }
   0xc   :  { %274 = vsyncadd [#allocation6], 4294965248  ;;  %v281_v0 = vmov 0   ;;  %v50_v1 = vld [vmem:[%s324_s0] sm:$0xff]  ;;  %v69_v2 = vld [vmem:[#allocation2 + $0x78] sm:$0xff]  ;;  %v52_v35 = vlaneseq  ;;  %v282_v38 = vmov 1.0  }
   0xd   :  { %194 = vset.pattern.permute.xlu0 %v281_v0  ;;  %98 = vmatpush.msra.mxu0 %v69_v2  ;;  %v68_v3 = vld [vmem:[#allocation2 + $0x70] sm:$0xff]  ;;  %v67_v4 = vld [vmem:[#allocation2 + $0x68] sm:$0xff]  ;;  %v85_v5 = vld [vmem:[#allocation5 + $0x78] sm:$0xff]  ;;  %vm150_vm2 = vcmask 7168   ;;  %s283_s0 = smov [#allocation7]   ;;  %s170_s5 = sshll.u32 %s328_s4, 4  ;;  %s171_s5 = int_to_ptr.hbm [resolvable:$true] %s170_s5 }
   0xe   :  { %87 = vperm.xlu0 %194, %v50_v1   ;;  %118 = vmatpush.msra.mxu1 %v85_v5  ;;  %v84_v6 = vld [vmem:[#allocation5 + $0x70] sm:$0xff]  ;;  %v66_v7 = vld [vmem:[#allocation2 + $0x60] sm:$0xff]  ;;  %v83_v8 = vld [vmem:[#allocation5 + $0x68] sm:$0xff]  ;;  %v53_v36 = vand.u32 127, %v52_v35 }
   0xf   :  { %99 = vmatpush.msra.mxu0 %v68_v3  ;;  %v51_v9 = vld [vmem:[%s325_s1] sm:$0xff]  ;;  %v65_v10 = vld [vmem:[#allocation2 + $0x58] sm:$0xff]  ;;  %v64_v12 = vld [vmem:[#allocation2 + $0x50] sm:$0xff]  ;;  %s168_s1 = sshll.u32 %s283_s0, 4  ;;  %s169_s1 = int_to_ptr.vmem [resolvable:$true] %s168_s1 }
  0x10   :  { %119 = vmatpush.msra.mxu1 %v84_v6  ;;  %v82_v11 = vld [vmem:[#allocation5 + $0x60] sm:$0xff]  ;;  %v81_v13 = vld [vmem:[#allocation5 + $0x58] sm:$0xff]  ;;  %v63_v14 = vld [vmem:[#allocation2 + $0x48] sm:$0xff] }
  0x11   :  { %100 = vmatpush.msra.mxu0 %v67_v4  ;;  %v80_v15 = vld [vmem:[#allocation5 + $0x50] sm:$0xff]  ;;  %v62_v16 = vld [vmem:[#allocation2 + $0x40] sm:$0xff]  ;;  %v79_v17 = vld [vmem:[#allocation5 + $0x48] sm:$0xff] }
  0x12   :  { %120 = vmatpush.msra.mxu1 %v83_v8  ;;  %v61_v18 = vld [vmem:[#allocation2 + $0x38] sm:$0xff]  ;;  %v78_v19 = vld [vmem:[#allocation5 + $0x40] sm:$0xff]  ;;  %v60_v20 = vld [vmem:[#allocation2 + $0x30] sm:$0xff] }
  0x13   :  { %101 = vmatpush.msra.mxu0 %v66_v7  ;;  %v77_v21 = vld [vmem:[#allocation5 + $0x38] sm:$0xff]  ;;  %v59_v22 = vld [vmem:[#allocation2 + $0x28] sm:$0xff]  ;;  %v76_v23 = vld [vmem:[#allocation5 + $0x30] sm:$0xff] }
  0x14   :  { %121 = vmatpush.msra.mxu1 %v82_v11  ;;  %v58_v24 = vld [vmem:[#allocation2 + $0x20] sm:$0xff]  ;;  %v75_v25 = vld [vmem:[#allocation5 + $0x28] sm:$0xff]  ;;  %v57_v26 = vld [vmem:[#allocation2 + $0x18] sm:$0xff] }
  0x15   :  { %102 = vmatpush.msra.mxu0 %v65_v10  ;;  %v56_v27 = vld [vmem:[#allocation2 + $0x10] sm:$0xff]  ;;  %v55_v28 = vld [vmem:[#allocation2 + $0x8] sm:$0xff]  ;;  %v54_v29 = vld [vmem:[#allocation2] sm:$0xff] }
  0x16   :  { %93 = vperm.xlu0 %194, %v51_v9   ;;  %122 = vmatpush.msra.mxu1 %v81_v13  ;;  %v74_v30 = vld [vmem:[#allocation5 + $0x20] sm:$0xff]  ;;  %v73_v31 = vld [vmem:[#allocation5 + $0x18] sm:$0xff]  ;;  %v72_v32 = vld [vmem:[#allocation5 + $0x10] sm:$0xff] }
  0x17   :  { %103 = vmatpush.msra.mxu0 %v64_v12  ;;  %v71_v33 = vld [vmem:[#allocation5 + $0x8] sm:$0xff]  ;;  %v70_v34 = vld [vmem:[#allocation5] sm:$0xff] }
  0x18   :  { %123 = vmatpush.msra.mxu1 %v80_v15 }
  0x19   :  { %104 = vmatpush.msra.mxu0 %v63_v14 }
  0x1a   :  { %124 = vmatpush.msra.mxu1 %v79_v17 }
  0x1b   :  { %105 = vmatpush.msra.mxu0 %v62_v16 }
  0x1c   :  { %125 = vmatpush.msra.mxu1 %v78_v19 }
  0x1d   :  { %106 = vmatpush.msra.mxu0 %v61_v18 }
  0x1e   :  { %126 = vmatpush.msra.mxu1 %v77_v21 }
  0x1f   :  { %107 = vmatpush.msra.mxu0 %v60_v20 }
  0x20   :  { %127 = vmatpush.msra.mxu1 %v76_v23 }
  0x21   :  { %108 = vmatpush.msra.mxu0 %v59_v22 }
  0x22   :  { %128 = vmatpush.msra.mxu1 %v75_v25 }
  0x23   :  { %109 = vmatpush.msra.mxu0 %v58_v24 }
  0x24   :  { %129 = vmatpush.msra.mxu1 %v74_v30 }
  0x25   :  { %110 = vmatpush.msra.mxu0 %v57_v26 }
  0x26   :  { %130 = vmatpush.msra.mxu1 %v73_v31 }
  0x27   :  { %111 = vmatpush.msra.mxu0 %v56_v27 }
  0x28   :  { %131 = vmatpush.msra.mxu1 %v72_v32 }
  0x29   :  { %112 = vmatpush.msra.mxu0 %v55_v28 }
  0x2a   :  { %132 = vmatpush.msra.mxu1 %v71_v33 }
  0x2b   :  { %113 = vmatpush.msra.mxu0 %v54_v29 }
  0x2c   :  { %133 = vmatpush.msra.mxu1 %v70_v34 }
  0x80   :  { %v88_v37 = vpop.permute.xlu0 %87 }
  0x81   :  { %vm89_vm0 = vcmp.eq.s32.totalorder %v53_v36, %v88_v37 }
  0x82   :  { %183 = vmatmul.msk.f32.vlgmr.msra.gmra.mxu0 %vm89_vm0, %v282_v38 }
  0x88   :  { %v94_v39 = vpop.permute.xlu0 %93 }
  0x89   :  { %vm95_vm1 = vcmp.eq.s32.totalorder %v53_v36, %v94_v39 }
  0x8a   :  { %184 = vmatmul.msk.f32.vlgmr.msra.gmra.mxu1 %vm95_vm1, %v282_v38 }
  0xff   :  { %v115_v40 = vpop.f32.mrf.mxu0 }
 0x107   :  { %v135_v41 = vpop.f32.mrf.mxu1 }
 0x108   :  { %v138_v42 = vmul.f32 %v135_v41, %v115_v40 }
 0x10a   :  { %139 = vadd.xlane.f32.xlu1 %v138_v42 }
 0x17d   :  { %v140_v43 = vpop.xlane.xlu1 %139 }
 0x17e   :  { %v142_v44 = vand.u32 2147483647, %v140_v43  ;;  %v141_v50 = vmin.f32 %v140_v43, 0.0 }
 0x180   :  { %v143_v45 = vsub.f32 0.0, %v142_v44 }
 0x182   :  { %v144_v46 = vmul.f32 1.442695, %v143_v45 }
 0x184   :  { %195 = vpow2.f32 %v144_v46 }
 0x18a   :  { %v196_v47 = vpop.eup %195 }
 0x18b   :  { %v146_v48 = vadd.f32 1.0, %v196_v47 }
 0x18d   :  { %197 = vlog2.f32 %v146_v48 }
 0x193   :  { %v198_v49 = vpop.eup %197 }
 0x194   :  { %v148_v51 = vmul.f32 0.6931472, %v198_v49 }
 0x196   :  { %v149_v52 = vsub.f32 %v141_v50, %v148_v51 }
 0x198   :  { %v151_v53 = vsel %vm150_vm2, %v149_v52, 0.0 }
 0x199   :  { %152 = vadd.xlane.f32.xlu1 %v151_v53 }
 0x20c   :  { %v153_v54 = vpop.xlane.xlu1 %152 }
 0x20d   :  { %v154_v55 = vrot.slane %v153_v54, 4 }
 0x20f   :  { %v155_v56 = vadd.f32 %v154_v55, %v153_v54 }
 0x211   :  { %v156_v57 = vrot.slane %v155_v56, 2 }
 0x213   :  { %v157_v58 = vadd.f32 %v156_v57, %v155_v56 }
 0x215   :  { %v158_v59 = vrot.slane %v157_v58, 1 }
 0x217   :  { %v159_v60 = vadd.f32 %v158_v59, %v157_v58 }
 0x219   :  { %185 = vpush %v159_v60 }
 0x24a   :  { %s186_s6 = spop %185 }
 0x24b   :  { %v161_v61 = vstv %s186_s6 }
 0x24c   :  { %162 = vst [vmem:[#allocation7] sm:$0x1] %v161_v61 }
 0x24d   :  { %173 = dma.vmem_to_hbm [thread:$0]  %s169_s1, 16, %s171_s5, [#allocation4]  }
 0x24e   :  { %275 = dma.done.wait [#allocation4], 16  }
 0x24f   :  { %276 = vsyncadd [#allocation4], 4294967280 }
 0x250   :  { %178 = vsyncpa [#allocation3], 1 }
 0x251   :  { %179 = vsyncpa [#allocation6], 1 }
 0x252   :  { %180 = vsyncpa [#allocation4], 1 }

</bundles_post_ra>
